<compile_context>
chip_gen: v5e
topology: v5e:2x2
jax: 0.10.0
libtpu: 0.0.40
codegen_flags: <defaults>
</compile_context>

<pallas_src>
import functools

import jax
import jax.numpy as jnp
from jax.experimental import pallas as pl
from jax.experimental.pallas import tpu as pltpu

LN_EPS = 1e-5


def _round_up(x, m):
    return ((x + m - 1) // m) * m


def _vmem_limit_bytes():
    # v5e/v6e: 128 MiB physical -> 96 MiB limit; v7x: 64 MiB -> 48 MiB.
    try:
        cap = int(pltpu.get_tpu_info().vmem_capacity_bytes)
    except Exception:  # conservative fallback, safe on every generation
        cap = 64 * 1024 * 1024
    return max(32 * 1024 * 1024, min(96 * 1024 * 1024, (cap * 3) // 4))


# ---------------------------------------------------------------------------
# Stage 0: XW = X @ W  (computed once per layer; hoisted out of the reduction)
# grid = (N_tiles,)
# ---------------------------------------------------------------------------
def xw_kernel(x_ref, w_ref, xw_ref):
    xw_ref[...] = jnp.dot(x_ref[...], w_ref[...],
                          preferred_element_type=jnp.float32).astype(xw_ref.dtype)


# ---------------------------------------------------------------------------
# Stage 1: hyperedge aggregation   M1 = (B^-1 H^T) @ XW
# grid = (E_tiles, N_tiles); node axis is the reduction (last, "arbitrary").
# The fp32 output block is the accumulator (resident across the N axis).
# ---------------------------------------------------------------------------
def edge_agg_kernel(htb_ref, xw_ref, m1_ref):
    @pl.when(pl.program_id(1) == 0)
    def _():
        m1_ref[...] = jnp.zeros_like(m1_ref)

    m1_ref[...] += jnp.dot(htb_ref[...], xw_ref[...],
                           preferred_element_type=jnp.float32)


# ---------------------------------------------------------------------------
# Stage 2: node aggregation + bias + LayerNorm + PReLU
#   M2 = (D^-1 H) @ M1 ; y = M2 + b ; LN over the *real* f_out features ; PReLU
# grid = (N_tiles, E_tiles); hyperedge axis is the reduction (last, "arbitrary").
# The fp32 output block is the accumulator; the epilogue rewrites it in place.
# pgb_ref rows: 0 = bias, 1 = gamma, 2 = beta (rest zero padding).
# ---------------------------------------------------------------------------
def node_agg_kernel(hn_ref, m1_ref, pgb_ref, alpha_ref, o_ref, *, f_out, matmul_dtype):
    @pl.when(pl.program_id(1) == 0)
    def _():
        o_ref[...] = jnp.zeros_like(o_ref)

    o_ref[...] += jnp.dot(hn_ref[...], m1_ref[...].astype(matmul_dtype),
                          preferred_element_type=jnp.float32)

    @pl.when(pl.program_id(1) == pl.num_programs(1) - 1)
    def _():
        y = o_ref[...] + pgb_ref[0:1, :]
        # Padded feature columns of y are exactly zero (padded W/bias/gamma/beta
        # columns are zero), so full-width sums divided by the real f_out give the
        # correct LayerNorm statistics (E[y^2] - mean^2).
        inv_f = jnp.float32(1.0 / f_out)
        mean = jnp.sum(y, axis=-1, keepdims=True) * inv_f
        var = jnp.sum(y * y, axis=-1, keepdims=True) * inv_f - mean * mean
        yn = (y - mean) * jax.lax.rsqrt(var + LN_EPS)
        yn = yn * pgb_ref[1:2, :] + pgb_ref[2:3, :]
        a = alpha_ref[0, 0]                        # PReLU alpha from SMEM
        o_ref[...] = jnp.where(yn > 0, yn, yn * a)


# ---------------------------------------------------------------------------
# One HGNN layer = three tiled pallas_calls (XW, edge agg, node agg + epilogue).
# ---------------------------------------------------------------------------
def hgnn_layer(x_p, w_p, pgb_p, alpha, hn_p, htb_p, f_out,
               tile_n, tile_e, matmul_dtype, vmem_limit):
    n_pad, f_in_pad = x_p.shape
    e_pad = htb_p.shape[0]
    f_out_pad = w_p.shape[1]

    cp1 = pltpu.CompilerParams(dimension_semantics=("parallel",),
                               vmem_limit_bytes=vmem_limit)
    cp2 = pltpu.CompilerParams(dimension_semantics=("parallel", "arbitrary"),
                               vmem_limit_bytes=vmem_limit)

    # --- stage 0: XW = X @ W (once per layer) ------------------------------
    xw = pl.pallas_call(
        xw_kernel,
        out_shape=jax.ShapeDtypeStruct((n_pad, f_out_pad), matmul_dtype),
        grid_spec=pltpu.PrefetchScalarGridSpec(
            num_scalar_prefetch=0,
            grid=(n_pad // tile_n,),
            in_specs=[
                pl.BlockSpec((tile_n, f_in_pad), lambda i: (i, 0)),     # X
                pl.BlockSpec((f_in_pad, f_out_pad), lambda i: (0, 0)),  # W (resident)
            ],
            out_specs=pl.BlockSpec((tile_n, f_out_pad), lambda i: (i, 0)),
        ),
        compiler_params=cp1,
    )(x_p, w_p)

    # --- stage 1: M1 = HtB @ XW --------------------------------------------
    m1 = pl.pallas_call(
        edge_agg_kernel,
        out_shape=jax.ShapeDtypeStruct((e_pad, f_out_pad), jnp.float32),
        grid_spec=pltpu.PrefetchScalarGridSpec(
            num_scalar_prefetch=0,
            grid=(e_pad // tile_e, n_pad // tile_n),
            in_specs=[
                pl.BlockSpec((tile_e, tile_n), lambda e, n: (e, n)),    # HtB
                pl.BlockSpec((tile_n, f_out_pad), lambda e, n: (n, 0)), # XW
            ],
            out_specs=pl.BlockSpec((tile_e, f_out_pad), lambda e, n: (e, 0)),
        ),
        compiler_params=cp2,
    )(htb_p, xw)

    # --- stage 2: out = prelu(layernorm(Hn @ M1 + bias)) --------------------
    out = pl.pallas_call(
        functools.partial(node_agg_kernel, f_out=f_out, matmul_dtype=matmul_dtype),
        out_shape=jax.ShapeDtypeStruct((n_pad, f_out_pad), jnp.float32),
        grid_spec=pltpu.PrefetchScalarGridSpec(
            num_scalar_prefetch=0,
            grid=(n_pad // tile_n, e_pad // tile_e),
            in_specs=[
                pl.BlockSpec((tile_n, tile_e), lambda i, e: (i, e)),    # Hn
                pl.BlockSpec((tile_e, f_out_pad), lambda i, e: (e, 0)), # M1
                pl.BlockSpec((8, f_out_pad), lambda i, e: (0, 0)),      # bias/gamma/beta
                pl.BlockSpec((1, 1), lambda i, e: (0, 0),
                             memory_space=pltpu.MemorySpace.SMEM),      # alpha
            ],
            out_specs=pl.BlockSpec((tile_n, f_out_pad), lambda i, e: (i, 0)),
        ),
        compiler_params=cp2,
    )(hn_p, m1, pgb_p, alpha)
    return out


# ---------------------------------------------------------------------------
# Wrapper-side precompute (weight standardization, incidence, padding, folding).
# ---------------------------------------------------------------------------
def standardize_weight(w):
    # torch.var_mean(weight, dim=1, keepdim=True): per output row, unbiased var
    mean = jnp.mean(w, axis=1, keepdims=True)
    var = jnp.var(w, axis=1, ddof=1, keepdims=True)
    return (w - mean) / jnp.sqrt(var + 1e-5)


def build_incidence(hyperedge_index, num_nodes, num_edges):
    """Dense incidence with multiplicity; degrees match PyG scatter sums exactly."""
    node_idx, edge_idx = hyperedge_index[0], hyperedge_index[1]
    h = jnp.zeros((num_nodes, num_edges), jnp.float32).at[node_idx, edge_idx].add(1.0)
    d = jnp.sum(h, axis=1, keepdims=True)            # node degree  [N, 1]
    b = jnp.sum(h, axis=0, keepdims=True).T          # edge degree  [E, 1]
    dinv = jnp.where(d > 0, 1.0 / jnp.maximum(d, 1e-30), 0.0)
    binv = jnp.where(b > 0, 1.0 / jnp.maximum(b, 1e-30), 0.0)
    return h, dinv, binv


def hgnn_forward(edge_fea, hyperedge_index, params, num_edges,
                 weight_standardization=True, tile_n=256, tile_e=256,
                 matmul_dtype=jnp.float32):
    """Mirrors HGNN.forward (layer_norm=True, act='prelu')."""
    n, f_in0 = edge_fea.shape
    n_pad = _round_up(max(n, tile_n), tile_n)
    e_pad = _round_up(max(num_edges, tile_e), tile_e)

    h, dinv, binv = build_incidence(hyperedge_index, n, num_edges)
    # Fold degree scalings into the operands once; precompute H^T host-side so the
    # kernels never transpose the big incidence tile on-chip.
    hn = dinv * h                                     # D^-1 H   [N, E]
    htb = binv * h.T                                  # B^-1 H^T [E, N]
    hn_p = jnp.zeros((n_pad, e_pad), matmul_dtype).at[:n, :num_edges].set(
        hn.astype(matmul_dtype))
    htb_p = jnp.zeros((e_pad, n_pad), matmul_dtype).at[:num_edges, :n].set(
        htb.astype(matmul_dtype))

    f_in_pad = _round_up(f_in0, 128)                  # per-layer lane-dense padding
    x = jnp.zeros((n_pad, f_in_pad), matmul_dtype).at[:n, :f_in0].set(
        edge_fea.astype(matmul_dtype))
    alpha = jnp.asarray(params["prelu_alpha"], jnp.float32).reshape(1, 1)

    vmem_limit = _vmem_limit_bytes()

    f_out = f_in0
    for i, layer in enumerate(params["layers"]):
        w = layer["weight"]                           # torch layout [out, in]
        if weight_standardization and i > 0:          # first conv skipped
            w = standardize_weight(w)
        f_out, f_in_l = w.shape
        f_out_pad = _round_up(f_out, 128)
        w_p = jnp.zeros((f_in_pad, f_out_pad), matmul_dtype).at[:f_in_l, :f_out].set(
            w.T.astype(matmul_dtype))
        pgb = jnp.zeros((8, f_out_pad), jnp.float32)  # fused bias/gamma/beta operand
        pgb = pgb.at[0, :f_out].set(layer["bias"])
        pgb = pgb.at[1, :f_out].set(layer["ln_gamma"])
        pgb = pgb.at[2, :f_out].set(layer["ln_beta"])

        out = hgnn_layer(x, w_p, pgb, alpha, hn_p, htb_p, f_out,
                         tile_n, tile_e, matmul_dtype, vmem_limit)
        x = out if out.dtype == matmul_dtype else out.astype(matmul_dtype)
        f_in_pad = f_out_pad

    return out[:n, :f_out]


def init_params(key, layer_sizes):
    layers = []
    for i in range(len(layer_sizes) - 1):
        key, kw = jax.random.split(key)
        f_in, f_out = layer_sizes[i], layer_sizes[i + 1]
        layers.append(dict(
            weight=0.1 * jax.random.normal(kw, (f_out, f_in), jnp.float32),
            bias=jnp.zeros((f_out,), jnp.float32),    # HypergraphConv bias init = zeros
            ln_gamma=jnp.ones((f_out,), jnp.float32),
            ln_beta=jnp.zeros((f_out,), jnp.float32),
        ))
    return dict(layers=layers, prelu_alpha=jnp.array(0.25, jnp.float32))


def reference_forward(edge_fea, hyperedge_index, params, num_edges):
    """Pure-JAX reference for sanity checking."""
    n = edge_fea.shape[0]
    h, dinv, binv = build_incidence(hyperedge_index, n, num_edges)
    x = edge_fea
    for i, layer in enumerate(params["layers"]):
        w = layer["weight"]
        if i > 0:
            w = standardize_weight(w)
        xw = x @ w.T
        m1 = binv * (h.T @ xw)
        m2 = dinv * (h @ m1)
        y = m2 + layer["bias"][None, :]
        mean = jnp.mean(y, axis=-1, keepdims=True)
        var = jnp.mean((y - mean) ** 2, axis=-1, keepdims=True)
        yn = (y - mean) * jax.lax.rsqrt(var + LN_EPS)
        yn = yn * layer["ln_gamma"][None, :] + layer["ln_beta"][None, :]
        x = jnp.where(yn > 0, yn, yn * params["prelu_alpha"])
    return x


if __name__ == "__main__":
    key = jax.random.PRNGKey(0)
    k_feat, k_node, k_param = jax.random.split(key, 3)

    # Small synthetic hypergraph: 300 nodes, 260 hyperedges, 6 incidences/hyperedge.
    # Padded internally to 512 nodes x 512 edges so with 256-wide tiles every
    # parallel grid axis has 2 tiles and the reduction axes have 2 steps.
    N, E, PER_E = 300, 260, 6
    layer_sizes = [16, 32, 32]

    edge_idx = jnp.repeat(jnp.arange(E, dtype=jnp.int32), PER_E)          # [1560]
    node_idx = jax.random.randint(k_node, (E * PER_E,), 0, N, jnp.int32)  # [1560]
    hyperedge_index = jnp.stack([node_idx, edge_idx], axis=0)             # [2, 1560]

    edge_fea = jax.random.normal(k_feat, (N, layer_sizes[0]), jnp.float32)
    params = init_params(k_param, layer_sizes)

    out = hgnn_forward(edge_fea, hyperedge_index, params, num_edges=E)
    out = jax.block_until_ready(out)

    ref = reference_forward(edge_fea, hyperedge_index, params, num_edges=E)
    assert out.shape == (N, layer_sizes[-1])
    assert jnp.allclose(out, ref, atol=2e-4, rtol=2e-4), "mismatch vs reference"

    print("KERNEL_OK")
</pallas_src>

<mosaic_0001>
module attributes {stable_mosaic.version = 11 : i64} {
  func.func @xw_kernel(%arg0: i32, %arg1: memref<256x128xf32, #tpu.memory_space<vmem>>, %arg2: memref<128x128xf32, #tpu.memory_space<vmem>>, %arg3: memref<256x128xf32, #tpu.memory_space<vmem>>) attributes {dimension_semantics = [#tpu.dimension_semantics<parallel>], iteration_bounds = array<i64: 2>, scalar_prefetch = 0 : i64, scratch_operands = 0 : i64, tpu.core_type = #tpu.core_type<tc>, window_params = [{transform_indices = @transform_0, window_bounds = array<i64: 256, 128>}, {pipeline_mode = #tpu.pipeline_mode<synchronous>, transform_indices = @transform_1, window_bounds = array<i64: 128, 128>}, {transform_indices = @transform_2, window_bounds = array<i64: 256, 128>}]} {
    %c0 = arith.constant 0 : index
    %c0_0 = arith.constant 0 : index
    %0 = vector.load %arg1[%c0, %c0_0] : memref<256x128xf32, #tpu.memory_space<vmem>>, vector<256x128xf32>
    %c0_1 = arith.constant 0 : index
    %c0_2 = arith.constant 0 : index
    %1 = vector.load %arg2[%c0_1, %c0_2] : memref<128x128xf32, #tpu.memory_space<vmem>>, vector<128x128xf32>
    %cst = arith.constant dense<0.000000e+00> : vector<256x128xf32>
    %2 = tpu.matmul %0, %1, %cst {dimension_numbers = #tpu.dot_dimension_numbers<[1], [0], [0], [1], [0, 0, 1, 1], [], []>} : vector<256x128xf32>, vector<128x128xf32>, vector<256x128xf32> -> vector<256x128xf32>
    %c0_3 = arith.constant 0 : index
    %c0_4 = arith.constant 0 : index
    %3 = vector.load %arg3[%c0_3, %c0_4] : memref<256x128xf32, #tpu.memory_space<vmem>>, vector<256x128xf32>
    tpu.vector_store %arg3[%c0_3, %c0_4], %2 {strides = array<i32>} : memref<256x128xf32, #tpu.memory_space<vmem>>, vector<256x128xf32>,
    return
  }
  func.func @transform_0(%arg0: i32) -> (i32, i32) {
    %c0_i32 = arith.constant 0 : i32
    %c0_i32_0 = arith.constant 0 : i32
    return %arg0, %c0_i32 : i32, i32
  }
  func.func @transform_1(%arg0: i32) -> (i32, i32) {
    %c0_i32 = arith.constant 0 : i32
    %c0_i32_0 = arith.constant 0 : i32
    %c0_i32_1 = arith.constant 0 : i32
    return %c0_i32, %c0_i32_0 : i32, i32
  }
  func.func @transform_2(%arg0: i32) -> (i32, i32) {
    %c0_i32 = arith.constant 0 : i32
    %c0_i32_0 = arith.constant 0 : i32
    return %arg0, %c0_i32 : i32, i32
  }
}

</mosaic_0001>

<bundles_post_ra>
// kernel: tpu_custom_call.1
= control target key start
LH: loop header
LB: loop body
LE: loop exit
PB: predicated region body
PF: predicated region fallthrough
CT: control target
= control target key end

     0   :  { %7 = vsyncpa [#allocation3], 0  ;;  %s971_s0 = inlined_call_operand.hbm [shape: f32[512,128], index: 0, kind: input, shape index: {}]   ;;  %s972_s1 = inlined_call_operand.hbm [shape: f32[128,128], index: 1, kind: input, shape index: {}]   ;;  %s973_s2 = inlined_call_operand.hbm [shape: f32[512,128], index: 2, kind: output, shape index: {}]  }
   0x1   :  { %9 = vsyncpa [#allocation3 + $0x1], 0 }
   0x2   :  { %10 = vsyncpa [#allocation6], 0 }
   0x3   :  { %11 = vsyncpa [#allocation4], 0 }
   0x4   :  { %13 = vsyncpa [#allocation4 + $0x1], 0  ;;  %s754_s9 = smov 0   ;;  %s756_s10 = smov 0  }
   0x5   :  { %s758_s11 = smov 0   ;;  %s760_s12 = smov 0  }
   0x6 LB: > { %s775_s13 = sadd.s32 4294967295, %s732_s12   ;;  %s475_s14 = sadd.s32 4294967294, %s732_s12   ;;  %s732_s12 = sphi %s760_s12, %s983_s12   ;;  %s728_s11 = sphi %s758_s11, %s982_s11   ;;  %s724_s10 = sphi %s756_s10, %s981_s10   ;;  %s720_s9 = sphi %s754_s9, %s980_s9  }
   0x7   : > { %p39_p0 = scmp.ne.s32.totalorder %s724_s10, %s720_s9  ;;  %p40_p1 = scmp.eq.s32.totalorder %s775_s13, 0 }
   0x8   : > { %p84_p2 = scmp.eq.s32.totalorder %s775_s13, 1  ;;  %p90_p3 = scmp.eq.s32.totalorder %s475_s14, 1 }
   0x9   : > { %p784_p4 = por %p40_p1, %p39_p0  ;;  %p476_p5 = scmp.ge.s32.totalorder %s732_s12, 1 }
   0xa   : > { %p789_p6 = por %p90_p3, %p39_p0  ;;  %p97_p7 = scmp.lt.s32.totalorder %s732_s12, 3 }
   0xb   : > { %s108_s19 = sshll.u32 %s972_s1, 4  ;;  %s734_s21 = smov [#allocation5]   ;;  %s109_s19 = int_to_ptr.hbm [resolvable:$true] %s108_s19 }
   0xc   : > { %p797_p8 = pnand %p476_p5, %p97_p7  ;;  %s110_s22 = sshll.u32 %s734_s21, 4  ;;  %s111_s22 = int_to_ptr.vmem [resolvable:$true] %s110_s22 }
   0xd   : > { %s807_s23 = sadd.s32 1, %s732_s12   ;;  %s735_s24 = smov 128  }
   0xe   : > { %p549_p9 = pneg %p797_p8  ;;  %s736_s25 = smov 8  }
   0xf   : > { %s23_s26 = ssub.s32 %s732_s12, %s807_s23  ;;  %s26_s27 = sadd.s32 1, %s728_s11 }
  0x10   : > { %p550_p10 = pnand %p549_p9, %p40_p1  ;;  %p24_p12 = scmp.eq.s32.totalorder %s23_s26, 0 }
  0x11   : > { %p33_p13 = scmp.ne.s32.totalorder %s728_s11, %s724_s10  ;;  %p34_p0 = scmp.eq.s32.totalorder %s732_s12, 0 }
  0x12   : > { %552 = dma.hbm_to_vmem [thread:$0]  (!%p550_p10), %s109_s19, 2048, %s111_s22, [#allocation6], %s735_s24, %s735_s24, %s736_s25  }
  0x13   : > { %s819_s28 = scalar_select %p24_p12, %s728_s11, %s26_s27  }
  0x14   : > { %p823_p3 = por %p84_p2, %p33_p13  ;;  %p562_p5 = scmp.lt.s32.totalorder %s732_s12, 2 }
  0x15   : > { %s124_s30 = sand.u32 1, %s728_s11   ;;  %s491_s3 = sshll.u32 %s732_s12, 8 }
  0x16   : > { %p35_p7 = por %p34_p0, %p33_p13  ;;  %s479_s4 = sshll.u32 %s124_s30, 8 }
  0x17   : > { %s133_s7 = scalar_lea.hbm %s971_s0, %s491_s3  ;;  %s128_s14 = scalar_lea.vmem [#allocation2], %s479_s4 }
  0x18   : > { %s134_s8 = sshll.u32 %s133_s7, 4  ;;  %s136_s17 = sshll.u32 %s128_s14, 4  ;;  %s135_s8 = int_to_ptr.hbm [resolvable:$true] %s134_s8  ;;  %s137_s17 = int_to_ptr.vmem [resolvable:$true] %s136_s17 }
  0x19   : > { %p833_p9 = pnand %p562_p5, %p35_p7  ;;  %s125_s19 = scalar_lea.sflag [#allocation3], %s124_s30 }
  0x1a   : > { %s632_s21 = sshra.s32 %s135_s8, 4  ;;  %s639_s3 = scalar_lea.hbm %s971_s0, 512  ;;  %s633_s21 = int_to_ptr.hbm [resolvable:$true] %s632_s21 }
  0x1b   : > { %s634_s22 = scalar_lea.hbm %s633_s21, 256  ;;  %p636_p10 = pneg %p833_p9 }
  0x1c   : > { %p635_p2 = scmp.ne.s32.totalorder %s633_s21, %s634_s22  ;;  %p640_p0 = scmp.lt.s32.totalorder %s633_s21, %s971_s0 }
  0x1d   : > { %p641_p5 = scmp.lt.s32.totalorder %s639_s3, %s634_s22 }
  0x1e   : > { %p637_p12 = pnand %p636_p10, %p635_p2 }
  0x1f   : > { %p642_p7 = por %p641_p5, %p640_p0 }
  0x20   : > { %p638_p13 = pneg %p637_p12 }
  0x22   : > { %p643_p11 = pnand %p642_p7, %p638_p13 }
  0x24   : > { %646 = shalt.err (!%p643_p11)
}
  0x25   : > { %556 = dma.hbm_to_vmem [thread:$0]  (!%p833_p9), %s135_s8, 4096, %s137_s17, %s125_s19, %s735_s24, %s735_s24, %s736_s25  }
  0x26   : > { %148 = sbr.rel (%p797_p8) target bundleno = 271 (0x10f), region = 28  ;;  %s853_s30 = sand.u32 (!%p797_p8), 1, %s724_s10  }
  0x27   : > { %s483_s6 = sshll.u32 (!%p797_p8), %s853_s30, 8  ;;  %s151_s7 = scalar_lea.sflag (!%p797_p8), [#allocation3], %s853_s30 }
  0x28   : > { %s859_s14 = scalar_lea.vmem (!%p797_p8), [#allocation2], %s483_s6 }
  0x2b   : > { %707 = dma.done.wait (%p784_p4), %s151_s7, 4096  }
  0x2c   : > { %709 = vsyncadd (%p784_p4), %s151_s7, 4294963200 }
  0x2d   : > { %711 = dma.done.wait (%p40_p1), [#allocation6], 2048  }
  0x2e   : > { %713 = vsyncadd (%p40_p1), [#allocation6], 4294965248  ;;  %v230_v0 = vld [vmem:[#allocation5 + $0x78] sm:$0xff]  ;;  %v229_v1 = vld [vmem:[#allocation5 + $0x70] sm:$0xff]  ;;  %s903_s15 = scalar_lea.vmem [#allocation7], %s483_s6  ;;  %s492_s20 = sshll.u32 %s775_s13, 8 }
  0x2f   : > { %494 = vmatpush.msra.mxu2 %v230_v0  ;;  %495 = vmatpush.msra.mxu3 %v230_v0  ;;  %v228_v2 = vld [vmem:[#allocation5 + $0x68] sm:$0xff]  ;;  %v227_v3 = vld [vmem:[#allocation5 + $0x60] sm:$0xff]  ;;  %v226_v4 = vld [vmem:[#allocation5 + $0x58] sm:$0xff]  ;;  %s388_s8 = scalar_lea.hbm %s973_s2, %s492_s20  ;;  %s389_s17 = sshll.u32 %s903_s15, 4  ;;  %s390_s17 = int_to_ptr.vmem [resolvable:$true] %s389_s17 }
  0x30   : > { %231 = vmatpush.msra.mxu0 %v230_v0  ;;  %493 = vmatpush.msra.mxu1 %v230_v0  ;;  %v225_v5 = vld [vmem:[#allocation5 + $0x50] sm:$0xff]  ;;  %v224_v6 = vld [vmem:[#allocation5 + $0x48] sm:$0xff]  ;;  %v223_v7 = vld [vmem:[#allocation5 + $0x40] sm:$0xff]  ;;  %s391_s18 = sshll.u32 %s388_s8, 4  ;;  %s377_s13 = scalar_lea.sflag [#allocation4], %s853_s30  ;;  %s392_s18 = int_to_ptr.hbm [resolvable:$true] %s391_s18 }
  0x31   : > { %497 = vmatpush.msra.mxu2 %v229_v1  ;;  %498 = vmatpush.msra.mxu3 %v229_v1  ;;  %v222_v8 = vld [vmem:[#allocation5 + $0x38] sm:$0xff]  ;;  %v221_v9 = vld [vmem:[#allocation5 + $0x30] sm:$0xff]  ;;  %v220_v10 = vld [vmem:[#allocation5 + $0x28] sm:$0xff]  ;;  %s676_s19 = sshra.s32 %s392_s18, 4  ;;  %s682_s27 = scalar_lea.hbm %s973_s2, 512  ;;  %s677_s19 = int_to_ptr.hbm [resolvable:$true] %s676_s19 }
  0x32   : > { %232 = vmatpush.msra.mxu0 %v229_v1  ;;  %496 = vmatpush.msra.mxu1 %v229_v1  ;;  %v219_v11 = vld [vmem:[#allocation5 + $0x20] sm:$0xff]  ;;  %v218_v12 = vld [vmem:[#allocation5 + $0x18] sm:$0xff]  ;;  %v217_v13 = vld [vmem:[#allocation5 + $0x10] sm:$0xff]  ;;  %s678_s21 = scalar_lea.hbm %s677_s19, 256  ;;  %p683_p11 = scmp.lt.s32.totalorder %s677_s19, %s973_s2 }
  0x33   : > { %500 = vmatpush.msra.mxu2 %v228_v2  ;;  %501 = vmatpush.msra.mxu3 %v228_v2  ;;  %v216_v14 = vld [vmem:[#allocation5 + $0x8] sm:$0xff]  ;;  %v215_v15 = vld [vmem:[#allocation5] sm:$0xff]  ;;  %v201_v24 = vld [vmem:[%s859_s14 + $0x90] sm:$0xff]  ;;  %p679_p1 = scmp.ne.s32.totalorder %s677_s19, %s678_s21  ;;  %p684_p9 = scmp.lt.s32.totalorder %s682_s27, %s678_s21 }
  0x34   : > { %233 = vmatpush.msra.mxu0 %v228_v2  ;;  %499 = vmatpush.msra.mxu1 %v228_v2  ;;  %v199_v16 = vld [vmem:[%s859_s14 + $0x80] sm:$0xff]  ;;  %v200_v20 = vld [vmem:[%s859_s14 + $0x88] sm:$0xff]  ;;  %v209_v25 = vld [vmem:[%s859_s14 + $0xd0] sm:$0xff] }
  0x35   : > { %503 = vmatpush.msra.mxu2 %v227_v3  ;;  %504 = vmatpush.msra.mxu3 %v227_v3  ;;  %v207_v17 = vld [vmem:[%s859_s14 + $0xc0] sm:$0xff]  ;;  %v208_v21 = vld [vmem:[%s859_s14 + $0xc8] sm:$0xff]  ;;  %v185_v26 = vld [vmem:[%s859_s14 + $0x10] sm:$0xff]  ;;  %p680_p4 = pnand %p679_p1, %p823_p3  ;;  %p685_p2 = por %p684_p9, %p683_p11 }
  0x36   : > { %234 = vmatpush.msra.mxu0 %v227_v3  ;;  %502 = vmatpush.msra.mxu1 %v227_v3  ;;  %v183_v18 = vld [vmem:[%s859_s14] sm:$0xff]  ;;  %v184_v22 = vld [vmem:[%s859_s14 + $0x8] sm:$0xff]  ;;  %v193_v27 = vld [vmem:[%s859_s14 + $0x50] sm:$0xff] }
  0x37   : > { %506 = vmatpush.msra.mxu2 %v226_v4  ;;  %507 = vmatpush.msra.mxu3 %v226_v4  ;;  %v191_v19 = vld [vmem:[%s859_s14 + $0x40] sm:$0xff]  ;;  %v192_v23 = vld [vmem:[%s859_s14 + $0x48] sm:$0xff]  ;;  %v202_v28 = vld [vmem:[%s859_s14 + $0x98] sm:$0xff]  ;;  %p681_p8 = pneg %p680_p4 }
  0x38   : > { %235 = vmatpush.msra.mxu0 %v226_v4  ;;  %505 = vmatpush.msra.mxu1 %v226_v4  ;;  %v210_v29 = vld [vmem:[%s859_s14 + $0xd8] sm:$0xff]  ;;  %v203_v32 = vld [vmem:[%s859_s14 + $0xa0] sm:$0xff]  ;;  %v204_v36 = vld [vmem:[%s859_s14 + $0xa8] sm:$0xff] }
  0x39   : > { %509 = vmatpush.msra.mxu2 %v225_v5  ;;  %510 = vmatpush.msra.mxu3 %v225_v5  ;;  %v186_v30 = vld [vmem:[%s859_s14 + $0x18] sm:$0xff]  ;;  %v211_v33 = vld [vmem:[%s859_s14 + $0xe0] sm:$0xff]  ;;  %v212_v37 = vld [vmem:[%s859_s14 + $0xe8] sm:$0xff]  ;;  %p686_p10 = pnand %p685_p2, %p681_p8 }
  0x3a   : > { %236 = vmatpush.msra.mxu0 %v225_v5  ;;  %508 = vmatpush.msra.mxu1 %v225_v5  ;;  %v194_v31 = vld [vmem:[%s859_s14 + $0x58] sm:$0xff]  ;;  %v187_v34 = vld [vmem:[%s859_s14 + $0x20] sm:$0xff]  ;;  %v188_v38 = vld [vmem:[%s859_s14 + $0x28] sm:$0xff] }
  0x3b   : > { %512 = vmatpush.msra.mxu2 %v224_v6  ;;  %513 = vmatpush.msra.mxu3 %v224_v6  ;;  %v195_v35 = vld [vmem:[%s859_s14 + $0x60] sm:$0xff]  ;;  %v196_v39 = vld [vmem:[%s859_s14 + $0x68] sm:$0xff]  ;;  %v205_v40 = vld [vmem:[%s859_s14 + $0xb0] sm:$0xff] }
  0x3c   : > { %237 = vmatpush.msra.mxu0 %v224_v6  ;;  %511 = vmatpush.msra.mxu1 %v224_v6  ;;  %v213_v41 = vld [vmem:[%s859_s14 + $0xf0] sm:$0xff]  ;;  %v206_v44 = vld [vmem:[%s859_s14 + $0xb8] sm:$0xff] }
  0x3d   : > { %515 = vmatpush.msra.mxu2 %v223_v7  ;;  %516 = vmatpush.msra.mxu3 %v223_v7  ;;  %v189_v42 = vld [vmem:[%s859_s14 + $0x30] sm:$0xff]  ;;  %v214_v45 = vld [vmem:[%s859_s14 + $0xf8] sm:$0xff] }
  0x3e   : > { %238 = vmatpush.msra.mxu0 %v223_v7  ;;  %514 = vmatpush.msra.mxu1 %v223_v7  ;;  %v197_v43 = vld [vmem:[%s859_s14 + $0x70] sm:$0xff]  ;;  %v190_v46 = vld [vmem:[%s859_s14 + $0x38] sm:$0xff] }
  0x3f   : > { %518 = vmatpush.msra.mxu2 %v222_v8  ;;  %519 = vmatpush.msra.mxu3 %v222_v8  ;;  %v198_v47 = vld [vmem:[%s859_s14 + $0x78] sm:$0xff] }
  0x40   : > { %239 = vmatpush.msra.mxu0 %v222_v8  ;;  %517 = vmatpush.msra.mxu1 %v222_v8 }
  0x41   : > { %521 = vmatpush.msra.mxu2 %v221_v9  ;;  %522 = vmatpush.msra.mxu3 %v221_v9 }
  0x42   : > { %240 = vmatpush.msra.mxu0 %v221_v9  ;;  %520 = vmatpush.msra.mxu1 %v221_v9 }
  0x43   : > { %524 = vmatpush.msra.mxu2 %v220_v10  ;;  %525 = vmatpush.msra.mxu3 %v220_v10 }
  0x44   : > { %241 = vmatpush.msra.mxu0 %v220_v10  ;;  %523 = vmatpush.msra.mxu1 %v220_v10 }
  0x45   : > { %527 = vmatpush.msra.mxu2 %v219_v11  ;;  %528 = vmatpush.msra.mxu3 %v219_v11 }
  0x46   : > { %242 = vmatpush.msra.mxu0 %v219_v11  ;;  %526 = vmatpush.msra.mxu1 %v219_v11 }
  0x47   : > { %530 = vmatpush.msra.mxu2 %v218_v12  ;;  %531 = vmatpush.msra.mxu3 %v218_v12 }
  0x48   : > { %243 = vmatpush.msra.mxu0 %v218_v12  ;;  %529 = vmatpush.msra.mxu1 %v218_v12 }
  0x49   : > { %533 = vmatpush.msra.mxu2 %v217_v13  ;;  %534 = vmatpush.msra.mxu3 %v217_v13 }
  0x4a   : > { %244 = vmatpush.msra.mxu0 %v217_v13  ;;  %532 = vmatpush.msra.mxu1 %v217_v13 }
  0x4b   : > { %536 = vmatpush.msra.mxu2 %v216_v14  ;;  %537 = vmatpush.msra.mxu3 %v216_v14 }
  0x4c   : > { %245 = vmatpush.msra.mxu0 %v216_v14  ;;  %535 = vmatpush.msra.mxu1 %v216_v14 }
  0x4d   : > { %539 = vmatpush.msra.mxu2 %v215_v15  ;;  %540 = vmatpush.msra.mxu3 %v215_v15 }
  0x4e   : > { %295 = vmatmul.f32.vlgmr.msra.gmra.mxu2 %v199_v16  ;;  %319 = vmatmul.f32.vlgmr.msra.gmra.mxu3 %v207_v17 }
  0x4f   : > { %246 = vmatpush.msra.mxu0 %v215_v15  ;;  %538 = vmatpush.msra.mxu1 %v215_v15 }
  0x50   : > { %247 = vmatmul.f32.vlgmr.msra.gmra.mxu0 %v183_v18  ;;  %271 = vmatmul.f32.vlgmr.msra.gmra.mxu1 %v191_v19 }
  0x56   : > { %298 = vmatmul.f32.gmra.mxu2 %v200_v20  ;;  %322 = vmatmul.f32.gmra.mxu3 %v208_v21 }
  0x58   : > { %250 = vmatmul.f32.gmra.mxu0 %v184_v22  ;;  %274 = vmatmul.f32.gmra.mxu1 %v192_v23 }
  0x5e   : > { %301 = vmatmul.f32.gmra.mxu2 %v201_v24  ;;  %325 = vmatmul.f32.gmra.mxu3 %v209_v25 }
  0x60   : > { %253 = vmatmul.f32.gmra.mxu0 %v185_v26  ;;  %277 = vmatmul.f32.gmra.mxu1 %v193_v27 }
  0x66   : > { %304 = vmatmul.f32.gmra.mxu2 %v202_v28  ;;  %328 = vmatmul.f32.gmra.mxu3 %v210_v29 }
  0x68   : > { %256 = vmatmul.f32.gmra.mxu0 %v186_v30  ;;  %280 = vmatmul.f32.gmra.mxu1 %v194_v31 }
  0x6e   : > { %307 = vmatmul.f32.gmra.mxu2 %v203_v32  ;;  %331 = vmatmul.f32.gmra.mxu3 %v211_v33 }
  0x70   : > { %259 = vmatmul.f32.gmra.mxu0 %v187_v34  ;;  %283 = vmatmul.f32.gmra.mxu1 %v195_v35 }
  0x76   : > { %310 = vmatmul.f32.gmra.mxu2 %v204_v36  ;;  %334 = vmatmul.f32.gmra.mxu3 %v212_v37 }
  0x78   : > { %262 = vmatmul.f32.gmra.mxu0 %v188_v38  ;;  %286 = vmatmul.f32.gmra.mxu1 %v196_v39 }
  0x7e   : > { %313 = vmatmul.f32.gmra.mxu2 %v205_v40  ;;  %337 = vmatmul.f32.gmra.mxu3 %v213_v41 }
  0x80   : > { %265 = vmatmul.f32.gmra.mxu0 %v189_v42  ;;  %289 = vmatmul.f32.gmra.mxu1 %v197_v43 }
  0x86   : > { %316 = vmatmul.f32.gmra.mxu2 %v206_v44  ;;  %340 = vmatmul.f32.gmra.mxu3 %v214_v45 }
  0x88   : > { %268 = vmatmul.f32.gmra.mxu0 %v190_v46  ;;  %292 = vmatmul.f32.gmra.mxu1 %v198_v47 }
  0xcd   : > { %v248_v48 = vpop.f32.mrf.mxu0  ;;  %v272_v49 = vpop.f32.mrf.mxu1 }
  0xce   : > { %344 = vst [vmem:[%s903_s15] sm:$0xff] %v248_v48 }
  0xcf   : > { %352 = vst [vmem:[%s903_s15 + $0x40] sm:$0xff] %v272_v49 }
  0xd1   : > { %v296_v50 = vpop.f32.mrf.mxu2  ;;  %v320_v51 = vpop.f32.mrf.mxu3 }
  0xd2   : > { %360 = vst [vmem:[%s903_s15 + $0x80] sm:$0xff] %v296_v50 }
  0xd3   : > { %368 = vst [vmem:[%s903_s15 + $0xc0] sm:$0xff] %v320_v51 }
  0xd5   : > { %v251_v52 = vpop.f32.mrf.mxu0  ;;  %v275_v53 = vpop.f32.mrf.mxu1 }
  0xd6   : > { %345 = vst [vmem:[%s903_s15 + $0x8] sm:$0xff] %v251_v52 }
  0xd7   : > { %353 = vst [vmem:[%s903_s15 + $0x48] sm:$0xff] %v275_v53 }
  0xd9   : > { %v299_v54 = vpop.f32.mrf.mxu2  ;;  %v323_v55 = vpop.f32.mrf.mxu3 }
  0xda   : > { %361 = vst [vmem:[%s903_s15 + $0x88] sm:$0xff] %v299_v54 }
  0xdb   : > { %369 = vst [vmem:[%s903_s15 + $0xc8] sm:$0xff] %v323_v55 }
  0xdd   : > { %v254_v56 = vpop.f32.mrf.mxu0  ;;  %v278_v57 = vpop.f32.mrf.mxu1 }
  0xde   : > { %346 = vst [vmem:[%s903_s15 + $0x10] sm:$0xff] %v254_v56 }
  0xdf   : > { %354 = vst [vmem:[%s903_s15 + $0x50] sm:$0xff] %v278_v57 }
  0xe1   : > { %v302_v58 = vpop.f32.mrf.mxu2  ;;  %v326_v59 = vpop.f32.mrf.mxu3 }
  0xe2   : > { %362 = vst [vmem:[%s903_s15 + $0x90] sm:$0xff] %v302_v58 }
  0xe3   : > { %370 = vst [vmem:[%s903_s15 + $0xd0] sm:$0xff] %v326_v59 }
  0xe5   : > { %v257_v60 = vpop.f32.mrf.mxu0  ;;  %v281_v61 = vpop.f32.mrf.mxu1 }
  0xe6   : > { %347 = vst [vmem:[%s903_s15 + $0x18] sm:$0xff] %v257_v60 }
  0xe7   : > { %355 = vst [vmem:[%s903_s15 + $0x58] sm:$0xff] %v281_v61 }
  0xe9   : > { %v305_v62 = vpop.f32.mrf.mxu2  ;;  %v329_v63 = vpop.f32.mrf.mxu3 }
  0xea   : > { %363 = vst [vmem:[%s903_s15 + $0x98] sm:$0xff] %v305_v62 }
  0xeb   : > { %371 = vst [vmem:[%s903_s15 + $0xd8] sm:$0xff] %v329_v63 }
  0xed   : > { %v260_v0 = vpop.f32.mrf.mxu0  ;;  %v284_v1 = vpop.f32.mrf.mxu1 }
  0xee   : > { %348 = vst [vmem:[%s903_s15 + $0x20] sm:$0xff] %v260_v0 }
  0xef   : > { %356 = vst [vmem:[%s903_s15 + $0x60] sm:$0xff] %v284_v1 }
  0xf1   : > { %v308_v2 = vpop.f32.mrf.mxu2  ;;  %v332_v3 = vpop.f32.mrf.mxu3 }
  0xf2   : > { %364 = vst [vmem:[%s903_s15 + $0xa0] sm:$0xff] %v308_v2 }
  0xf3   : > { %372 = vst [vmem:[%s903_s15 + $0xe0] sm:$0xff] %v332_v3 }
  0xf5   : > { %v263_v4 = vpop.f32.mrf.mxu0  ;;  %v287_v5 = vpop.f32.mrf.mxu1 }
  0xf6   : > { %349 = vst [vmem:[%s903_s15 + $0x28] sm:$0xff] %v263_v4 }
  0xf7   : > { %357 = vst [vmem:[%s903_s15 + $0x68] sm:$0xff] %v287_v5 }
  0xf9   : > { %v311_v6 = vpop.f32.mrf.mxu2  ;;  %v335_v7 = vpop.f32.mrf.mxu3 }
  0xfa   : > { %365 = vst [vmem:[%s903_s15 + $0xa8] sm:$0xff] %v311_v6 }
  0xfb   : > { %373 = vst [vmem:[%s903_s15 + $0xe8] sm:$0xff] %v335_v7 }
  0xfd   : > { %v266_v8 = vpop.f32.mrf.mxu0  ;;  %v290_v9 = vpop.f32.mrf.mxu1 }
  0xfe   : > { %350 = vst [vmem:[%s903_s15 + $0x30] sm:$0xff] %v266_v8 }
  0xff   : > { %358 = vst [vmem:[%s903_s15 + $0x70] sm:$0xff] %v290_v9 }
 0x101   : > { %v314_v10 = vpop.f32.mrf.mxu2  ;;  %v338_v11 = vpop.f32.mrf.mxu3 }
 0x102   : > { %366 = vst [vmem:[%s903_s15 + $0xb0] sm:$0xff] %v314_v10 }
 0x103   : > { %374 = vst [vmem:[%s903_s15 + $0xf0] sm:$0xff] %v338_v11 }
 0x105   : > { %v269_v12 = vpop.f32.mrf.mxu0  ;;  %v293_v13 = vpop.f32.mrf.mxu1 }
 0x106   : > { %351 = vst [vmem:[%s903_s15 + $0x38] sm:$0xff] %v269_v12 }
 0x107   : > { %359 = vst [vmem:[%s903_s15 + $0x78] sm:$0xff] %v293_v13 }
 0x109   : > { %v317_v14 = vpop.f32.mrf.mxu2  ;;  %v341_v15 = vpop.f32.mrf.mxu3 }
 0x10a   : > { %367 = vst [vmem:[%s903_s15 + $0xb8] sm:$0xff] %v317_v14 }
 0x10b   : > { %375 = vst [vmem:[%s903_s15 + $0xf8] sm:$0xff] %v341_v15 }
 0x10c   : > { %689 = shalt.err (!%p686_p10)
}
 0x10d   : > { %s737_s5 = smov 128   ;;  %s738_s30 = smov 8  }
 0x10e   : > { %547 = dma.vmem_to_hbm [thread:$0]  (%p823_p3), %s390_s17, 4096, %s392_s18, %s377_s13, %s737_s5, %s737_s5, %s738_s30  }
 0x10f PF: > { %s406_s6 = sand.u32 1, %s720_s9   ;;  %p979_p12 = scmp.ge.s32.totalorder %s732_s12, 2 }
 0x110   : > { %s407_s7 = scalar_lea.sflag [#allocation4], %s406_s6 }
 0x111   : > { %p558_p13 = pnand %p979_p12, %p789_p6 }
 0x113   : > { %p559_p0 = pneg %p558_p13 }
 0x115   : > { %715 = dma.done.wait (%p559_p0), %s407_s7, 4096  }
 0x116   : > { %717 = vsyncadd (%p559_p0), %s407_s7, 4294963200  ;;  %p16_p5 = scmp.ge.s32.totalorder %s807_s23, 4   ;;  %s980_s9 = smov %s724_s10 }
 0x117   : > { %s981_s10 = smov %s728_s11  ;;  %s982_s11 = smov %s819_s28 }
 0x118   : > { %s983_s12 = smov %s807_s23  ;;  %18 = sbr.rel (!%p16_p5) target bundleno = 6 (0x6), region = 77 }
 0x11d   :  { %413 = vsyncpa [#allocation3], 1 }
 0x11e   :  { %415 = vsyncpa [#allocation3 + $0x1], 1 }
 0x11f   :  { %416 = vsyncpa [#allocation6], 1 }
 0x120   :  { %417 = vsyncpa [#allocation4], 1 }
 0x121   :  { %419 = vsyncpa [#allocation4 + $0x1], 1 }

</bundles_post_ra>
